<compile_context>
chip_gen: v5e
topology: v5e:2x2
jax: 0.10.0
libtpu: 0.0.40
codegen_flags: <defaults>
</compile_context>

<pallas_src>
import jax
import jax.numpy as jnp
import numpy as np
from jax.experimental import pallas as pl
from jax.experimental.pallas import tpu as pltpu


def _make_kernel(H, W, mxu_dtype=jnp.float32):
    """Kernel for one image processed as a lane-dense (C, S=H*W) tile."""
    S = H * W

    def dot(a, b):
        return jnp.dot(a.astype(mxu_dtype), b.astype(mxu_dtype),
                       preferred_element_type=jnp.float32)

    def kernel(x_ref, w1_ref, b1_ref, w2_ref, b2_ref, w3_ref, b3_ref,
               w4_ref, b4_ref, o_ref):
        x = x_ref[0]                                            # (Cin, S)

        # Boundary masks (2-D iota) reproducing zero padding for shifted taps.
        s_idx = jax.lax.broadcasted_iota(jnp.int32, (1, S), 1)  # flat spatial idx
        w_idx = s_idx % W                                       # column within row

        def shifted(t, amount, valid):
            # r[:, s] = t[:, s + amount] where `valid`, else 0 (zero padding).
            r = pltpu.roll(t, (-amount) % S, axis=1)            # XLU lane rotate
            return jnp.where(valid, r, 0.0)

        # ---- 1x1 conv (ch_in -> c4) + ReLU : (c4, Cin) @ (Cin, S) -----------
        t = jnp.maximum(dot(w1_ref[...], x) + b1_ref[...], 0.0)

        # ---- (3,1) conv, pad (1,0): taps h-1, h, h+1 (flat shifts of +/-W) --
        acc = dot(w2_ref[0], shifted(t, -W, s_idx >= W))                 # row above
        acc = acc + dot(w2_ref[1], t)                                    # center
        acc = acc + dot(w2_ref[2], shifted(t, W, s_idx < (H - 1) * W))   # row below
        t = jnp.maximum(acc + b2_ref[...], 0.0)

        # ---- (1,3) conv, pad (0,1): taps w-1, w, w+1 (flat shifts of +/-1) --
        acc = dot(w3_ref[0], shifted(t, -1, w_idx >= 1))                 # left
        acc = acc + dot(w3_ref[1], t)                                    # center
        acc = acc + dot(w3_ref[2], shifted(t, 1, w_idx <= W - 2))        # right
        t = jnp.maximum(acc + b3_ref[...], 0.0)

        # ---- 1x1 conv (c4 -> ch_out), no activation --------------------------
        o_ref[0] = dot(w4_ref[...], t) + b4_ref[...]    # (Cout, S) lane-dense store

    return kernel


def small_basic_block(x_nchw, kparams, mxu_dtype=jnp.float32):
    """x_nchw: (N, Cin, H, W) float32 -> (N, Cout, H, W) float32."""
    w1, b1, w2, b2, w3, b3, w4, b4 = kparams
    N, Cin, H, W = x_nchw.shape
    cout = w4.shape[0]
    S = H * W

    # Free, layout-preserving reshape: keep NCHW, fold H*W onto the lane axis.
    x = x_nchw.reshape(N, Cin, S).astype(jnp.float32)

    vmem = pltpu.MemorySpace.VMEM

    def param_spec(shape):
        nd = len(shape)
        return pl.BlockSpec(shape, lambda n, _nd=nd: (0,) * _nd, memory_space=vmem)

    out = pl.pallas_call(
        _make_kernel(H, W, mxu_dtype),
        out_shape=jax.ShapeDtypeStruct((N, cout, S), jnp.float32),
        grid=(N,),
        in_specs=[
            pl.BlockSpec((1, Cin, S), lambda n: (n, 0, 0)),
            param_spec(w1.shape), param_spec(b1.shape),
            param_spec(w2.shape), param_spec(b2.shape),
            param_spec(w3.shape), param_spec(b3.shape),
            param_spec(w4.shape), param_spec(b4.shape),
        ],
        out_specs=pl.BlockSpec((1, cout, S), lambda n: (n, 0, 0)),
        compiler_params=pltpu.CompilerParams(dimension_semantics=("parallel",)),
    )(x, w1, b1, w2, b2, w3, b3, w4, b4)

    return out.reshape(N, cout, H, W)               # free reshape back to NCHW


# --------------------- parameter setup & pure-JAX reference ---------------------

def init_torch_layout_params(key, ch_in, ch_out):
    """Deterministic synthetic params in PyTorch Conv2d layout (O, I, kH, kW)."""
    c4 = ch_out // 4
    ks = jax.random.split(key, 8)
    s = 0.5
    W1 = jax.random.normal(ks[0], (c4, ch_in, 1, 1), jnp.float32) * s
    b1 = jax.random.normal(ks[1], (c4,), jnp.float32) * 0.1
    W2 = jax.random.normal(ks[2], (c4, c4, 3, 1), jnp.float32) * s
    b2 = jax.random.normal(ks[3], (c4,), jnp.float32) * 0.1
    W3 = jax.random.normal(ks[4], (c4, c4, 1, 3), jnp.float32) * s
    b3 = jax.random.normal(ks[5], (c4,), jnp.float32) * 0.1
    W4 = jax.random.normal(ks[6], (ch_out, c4, 1, 1), jnp.float32) * s
    b4 = jax.random.normal(ks[7], (ch_out,), jnp.float32) * 0.1
    return (W1, b1, W2, b2, W3, b3, W4, b4)


def to_kernel_params(tp):
    """Convert PyTorch-layout params to the kernel's (Cout, Cin) / (C, 1) layout."""
    W1, b1, W2, b2, W3, b3, W4, b4 = tp
    w1 = W1[:, :, 0, 0]                                   # (c4, Cin)
    w2 = jnp.transpose(W2[:, :, :, 0], (2, 0, 1))         # (3, c4_out, c4_in), tap-major
    w3 = jnp.transpose(W3[:, :, 0, :], (2, 0, 1))         # (3, c4_out, c4_in)
    w4 = W4[:, :, 0, 0]                                   # (Cout, c4)
    return (w1, b1[:, None], w2, b2[:, None], w3, b3[:, None], w4, b4[:, None])


def reference(x, tp):
    W1, b1, W2, b2, W3, b3, W4, b4 = tp

    def conv(x, w, b, pad):
        y = jax.lax.conv_general_dilated(
            x, w, window_strides=(1, 1), padding=pad,
            dimension_numbers=('NCHW', 'OIHW', 'NCHW'))
        return y + b[None, :, None, None]

    t = jnp.maximum(conv(x, W1, b1, ((0, 0), (0, 0))), 0.0)
    t = jnp.maximum(conv(t, W2, b2, ((1, 1), (0, 0))), 0.0)
    t = jnp.maximum(conv(t, W3, b3, ((0, 0), (1, 1))), 0.0)
    return conv(t, W4, b4, ((0, 0), (0, 0)))


if __name__ == "__main__":
    key = jax.random.PRNGKey(0)
    kx, kp = jax.random.split(key)

    N, ch_in, H, W = 2, 4, 16, 16
    ch_out = 16

    x = jax.random.normal(kx, (N, ch_in, H, W), jnp.float32)
    torch_params = init_torch_layout_params(kp, ch_in, ch_out)
    kparams = to_kernel_params(torch_params)

    out = small_basic_block(x, kparams)          # f32 MXU; pass jnp.bfloat16 on v6e/v7x
    out = jax.block_until_ready(out)

    ref = reference(x, torch_params)
    np.testing.assert_allclose(np.asarray(out), np.asarray(ref),
                               atol=1e-3, rtol=1e-3)
    print("KERNEL_OK")
</pallas_src>

<mosaic_0001>
module attributes {stable_mosaic.version = 11 : i64} {
  func.func @kernel(%arg0: i32, %arg1: memref<1x4x256xf32, #tpu.memory_space<vmem>>, %arg2: memref<4x4xf32, #tpu.memory_space<vmem>>, %arg3: memref<4x1xf32, #tpu.memory_space<vmem>>, %arg4: memref<3x4x4xf32, #tpu.memory_space<vmem>>, %arg5: memref<4x1xf32, #tpu.memory_space<vmem>>, %arg6: memref<3x4x4xf32, #tpu.memory_space<vmem>>, %arg7: memref<4x1xf32, #tpu.memory_space<vmem>>, %arg8: memref<16x4xf32, #tpu.memory_space<vmem>>, %arg9: memref<16x1xf32, #tpu.memory_space<vmem>>, %arg10: memref<1x16x256xf32, #tpu.memory_space<vmem>>) attributes {dimension_semantics = [#tpu.dimension_semantics<parallel>], iteration_bounds = array<i64: 2>, scalar_prefetch = 0 : i64, scratch_operands = 0 : i64, tpu.core_type = #tpu.core_type<tc>, window_params = [{transform_indices = @transform_0, window_bounds = array<i64: 1, 4, 256>}, {pipeline_mode = #tpu.pipeline_mode<synchronous>, transform_indices = @transform_1, window_bounds = array<i64: 4, 4>}, {pipeline_mode = #tpu.pipeline_mode<synchronous>, transform_indices = @transform_2, window_bounds = array<i64: 4, 1>}, {pipeline_mode = #tpu.pipeline_mode<synchronous>, transform_indices = @transform_3, window_bounds = array<i64: 3, 4, 4>}, {pipeline_mode = #tpu.pipeline_mode<synchronous>, transform_indices = @transform_4, window_bounds = array<i64: 4, 1>}, {pipeline_mode = #tpu.pipeline_mode<synchronous>, transform_indices = @transform_5, window_bounds = array<i64: 3, 4, 4>}, {pipeline_mode = #tpu.pipeline_mode<synchronous>, transform_indices = @transform_6, window_bounds = array<i64: 4, 1>}, {pipeline_mode = #tpu.pipeline_mode<synchronous>, transform_indices = @transform_7, window_bounds = array<i64: 16, 4>}, {pipeline_mode = #tpu.pipeline_mode<synchronous>, transform_indices = @transform_8, window_bounds = array<i64: 16, 1>}, {transform_indices = @transform_9, window_bounds = array<i64: 1, 16, 256>}]} {
    %c0 = arith.constant 0 : index
    %c0_0 = arith.constant 0 : index
    %c0_1 = arith.constant 0 : index
    %0 = vector.load %arg1[%c0, %c0_0, %c0_1] : memref<1x4x256xf32, #tpu.memory_space<vmem>>, vector<1x4x256xf32>
    %1 = vector.shape_cast %0 : vector<1x4x256xf32> to vector<4x256xf32>
    %2 = tpu.iota {dimensions = array<i32: 1>} : vector<1x256xi32>
    %c16_i32 = arith.constant 16 : i32
    %c0_i32 = arith.constant 0 : i32
    %3 = arith.cmpi eq, %c16_i32, %c0_i32 : i32
    %c1_i32 = arith.constant 1 : i32
    %4 = arith.select %3, %c1_i32, %c16_i32 : i32
    %5 = vector.broadcast %4 : i32 to vector<1x256xi32>
    %6 = arith.remsi %2, %5 : vector<1x256xi32>
    %c0_i32_2 = arith.constant 0 : i32
    %7 = vector.broadcast %c0_i32_2 : i32 to vector<1x256xi32>
    %8 = arith.cmpi ne, %6, %7 : vector<1x256xi32>
    %c0_i32_3 = arith.constant 0 : i32
    %9 = vector.broadcast %c0_i32_3 : i32 to vector<1x256xi32>
    %10 = arith.cmpi slt, %6, %9 : vector<1x256xi32>
    %c0_i32_4 = arith.constant 0 : i32
    %11 = arith.cmpi slt, %4, %c0_i32_4 : i32
    %12 = vector.broadcast %11 : i1 to vector<1x256xi1>
    %13 = vector.broadcast %12 : vector<1x256xi1> to vector<1x256xi1>
    %14 = arith.xori %10, %13 : vector<1x256xi1>
    %15 = arith.andi %14, %8 : vector<1x256xi1>
    %16 = vector.broadcast %4 : i32 to vector<1x256xi32>
    %17 = arith.addi %6, %16 : vector<1x256xi32>
    %18 = arith.select %15, %17, %6 : vector<1x256xi1>, vector<1x256xi32>
    %c0_5 = arith.constant 0 : index
    %c0_6 = arith.constant 0 : index
    %19 = vector.load %arg2[%c0_5, %c0_6] : memref<4x4xf32, #tpu.memory_space<vmem>>, vector<4x4xf32>
    %cst = arith.constant dense<0.000000e+00> : vector<4x256xf32>
    %20 = tpu.matmul %19, %1, %cst {dimension_numbers = #tpu.dot_dimension_numbers<[1], [0], [0], [1], [0, 0, 1, 1], [], []>} : vector<4x4xf32>, vector<4x256xf32>, vector<4x256xf32> -> vector<4x256xf32>
    %c0_7 = arith.constant 0 : index
    %c0_8 = arith.constant 0 : index
    %21 = vector.load %arg3[%c0_7, %c0_8] : memref<4x1xf32, #tpu.memory_space<vmem>>, vector<4x1xf32>
    %22 = vector.broadcast %21 : vector<4x1xf32> to vector<4x256xf32>
    %23 = arith.addf %20, %22 : vector<4x256xf32>
    %cst_9 = arith.constant 0.000000e+00 : f32
    %24 = vector.broadcast %cst_9 : f32 to vector<4x256xf32>
    %25 = arith.maximumf %23, %24 : vector<4x256xf32>
    %c0_10 = arith.constant 0 : index
    %c0_11 = arith.constant 0 : index
    %c0_12 = arith.constant 0 : index
    %26 = vector.load %arg4[%c0_10, %c0_11, %c0_12] : memref<3x4x4xf32, #tpu.memory_space<vmem>>, vector<1x4x4xf32>
    %27 = vector.shape_cast %26 : vector<1x4x4xf32> to vector<4x4xf32>
    %c16_i32_13 = arith.constant 16 : i32
    %28 = vector.broadcast %c16_i32_13 : i32 to vector<1x256xi32>
    %29 = arith.cmpi sge, %2, %28 : vector<1x256xi32>
    %c16_i32_14 = arith.constant 16 : i32
    %30 = tpu.dynamic_rotate %25 by %c16_i32_14 dim 1 : vector<4x256xf32>, i32 -> vector<4x256xf32>
    %cst_15 = arith.constant 0.000000e+00 : f32
    %31 = vector.shape_cast %29 : vector<1x256xi1> to vector<1x256xi1>
    %32 = vector.broadcast %31 : vector<1x256xi1> to vector<4x256xi1>
    %33 = vector.broadcast %cst_15 : f32 to vector<4x256xf32>
    %34 = arith.select %32, %30, %33 : vector<4x256xi1>, vector<4x256xf32>
    %cst_16 = arith.constant dense<0.000000e+00> : vector<4x256xf32>
    %35 = tpu.matmul %27, %34, %cst_16 {dimension_numbers = #tpu.dot_dimension_numbers<[1], [0], [0], [1], [0, 0, 1, 1], [], []>} : vector<4x4xf32>, vector<4x256xf32>, vector<4x256xf32> -> vector<4x256xf32>
    %c1 = arith.constant 1 : index
    %c0_17 = arith.constant 0 : index
    %c0_18 = arith.constant 0 : index
    %36 = vector.load %arg4[%c1, %c0_17, %c0_18] : memref<3x4x4xf32, #tpu.memory_space<vmem>>, vector<1x4x4xf32>
    %37 = vector.shape_cast %36 : vector<1x4x4xf32> to vector<4x4xf32>
    %cst_19 = arith.constant dense<0.000000e+00> : vector<4x256xf32>
    %38 = tpu.matmul %37, %25, %cst_19 {dimension_numbers = #tpu.dot_dimension_numbers<[1], [0], [0], [1], [0, 0, 1, 1], [], []>} : vector<4x4xf32>, vector<4x256xf32>, vector<4x256xf32> -> vector<4x256xf32>
    %39 = arith.addf %35, %38 : vector<4x256xf32>
    %c2 = arith.constant 2 : index
    %c0_20 = arith.constant 0 : index
    %c0_21 = arith.constant 0 : index
    %40 = vector.load %arg4[%c2, %c0_20, %c0_21] : memref<3x4x4xf32, #tpu.memory_space<vmem>>, vector<1x4x4xf32>
    %41 = vector.shape_cast %40 : vector<1x4x4xf32> to vector<4x4xf32>
    %c240_i32 = arith.constant 240 : i32
    %42 = vector.broadcast %c240_i32 : i32 to vector<1x256xi32>
    %43 = arith.cmpi slt, %2, %42 : vector<1x256xi32>
    %c240_i32_22 = arith.constant 240 : i32
    %44 = tpu.dynamic_rotate %25 by %c240_i32_22 dim 1 : vector<4x256xf32>, i32 -> vector<4x256xf32>
    %cst_23 = arith.constant 0.000000e+00 : f32
    %45 = vector.shape_cast %43 : vector<1x256xi1> to vector<1x256xi1>
    %46 = vector.broadcast %45 : vector<1x256xi1> to vector<4x256xi1>
    %47 = vector.broadcast %cst_23 : f32 to vector<4x256xf32>
    %48 = arith.select %46, %44, %47 : vector<4x256xi1>, vector<4x256xf32>
    %cst_24 = arith.constant dense<0.000000e+00> : vector<4x256xf32>
    %49 = tpu.matmul %41, %48, %cst_24 {dimension_numbers = #tpu.dot_dimension_numbers<[1], [0], [0], [1], [0, 0, 1, 1], [], []>} : vector<4x4xf32>, vector<4x256xf32>, vector<4x256xf32> -> vector<4x256xf32>
    %50 = arith.addf %39, %49 : vector<4x256xf32>
    %c0_25 = arith.constant 0 : index
    %c0_26 = arith.constant 0 : index
    %51 = vector.load %arg5[%c0_25, %c0_26] : memref<4x1xf32, #tpu.memory_space<vmem>>, vector<4x1xf32>
    %52 = vector.broadcast %51 : vector<4x1xf32> to vector<4x256xf32>
    %53 = arith.addf %50, %52 : vector<4x256xf32>
    %cst_27 = arith.constant 0.000000e+00 : f32
    %54 = vector.broadcast %cst_27 : f32 to vector<4x256xf32>
    %55 = arith.maximumf %53, %54 : vector<4x256xf32>
    %c0_28 = arith.constant 0 : index
    %c0_29 = arith.constant 0 : index
    %c0_30 = arith.constant 0 : index
    %56 = vector.load %arg6[%c0_28, %c0_29, %c0_30] : memref<3x4x4xf32, #tpu.memory_space<vmem>>, vector<1x4x4xf32>
    %57 = vector.shape_cast %56 : vector<1x4x4xf32> to vector<4x4xf32>
    %c1_i32_31 = arith.constant 1 : i32
    %58 = vector.broadcast %c1_i32_31 : i32 to vector<1x256xi32>
    %59 = arith.cmpi sge, %18, %58 : vector<1x256xi32>
    %c1_i32_32 = arith.constant 1 : i32
    %60 = tpu.dynamic_rotate %55 by %c1_i32_32 dim 1 : vector<4x256xf32>, i32 -> vector<4x256xf32>
    %cst_33 = arith.constant 0.000000e+00 : f32
    %61 = vector.shape_cast %59 : vector<1x256xi1> to vector<1x256xi1>
    %62 = vector.broadcast %61 : vector<1x256xi1> to vector<4x256xi1>
    %63 = vector.broadcast %cst_33 : f32 to vector<4x256xf32>
    %64 = arith.select %62, %60, %63 : vector<4x256xi1>, vector<4x256xf32>
    %cst_34 = arith.constant dense<0.000000e+00> : vector<4x256xf32>
    %65 = tpu.matmul %57, %64, %cst_34 {dimension_numbers = #tpu.dot_dimension_numbers<[1], [0], [0], [1], [0, 0, 1, 1], [], []>} : vector<4x4xf32>, vector<4x256xf32>, vector<4x256xf32> -> vector<4x256xf32>
    %c1_35 = arith.constant 1 : index
    %c0_36 = arith.constant 0 : index
    %c0_37 = arith.constant 0 : index
    %66 = vector.load %arg6[%c1_35, %c0_36, %c0_37] : memref<3x4x4xf32, #tpu.memory_space<vmem>>, vector<1x4x4xf32>
    %67 = vector.shape_cast %66 : vector<1x4x4xf32> to vector<4x4xf32>
    %cst_38 = arith.constant dense<0.000000e+00> : vector<4x256xf32>
    %68 = tpu.matmul %67, %55, %cst_38 {dimension_numbers = #tpu.dot_dimension_numbers<[1], [0], [0], [1], [0, 0, 1, 1], [], []>} : vector<4x4xf32>, vector<4x256xf32>, vector<4x256xf32> -> vector<4x256xf32>
    %69 = arith.addf %65, %68 : vector<4x256xf32>
    %c2_39 = arith.constant 2 : index
    %c0_40 = arith.constant 0 : index
    %c0_41 = arith.constant 0 : index
    %70 = vector.load %arg6[%c2_39, %c0_40, %c0_41] : memref<3x4x4xf32, #tpu.memory_space<vmem>>, vector<1x4x4xf32>
    %71 = vector.shape_cast %70 : vector<1x4x4xf32> to vector<4x4xf32>
    %c14_i32 = arith.constant 14 : i32
    %72 = vector.broadcast %c14_i32 : i32 to vector<1x256xi32>
    %73 = arith.cmpi sle, %18, %72 : vector<1x256xi32>
    %c255_i32 = arith.constant 255 : i32
    %74 = tpu.dynamic_rotate %55 by %c255_i32 dim 1 : vector<4x256xf32>, i32 -> vector<4x256xf32>
    %cst_42 = arith.constant 0.000000e+00 : f32
    %75 = vector.shape_cast %73 : vector<1x256xi1> to vector<1x256xi1>
    %76 = vector.broadcast %75 : vector<1x256xi1> to vector<4x256xi1>
    %77 = vector.broadcast %cst_42 : f32 to vector<4x256xf32>
    %78 = arith.select %76, %74, %77 : vector<4x256xi1>, vector<4x256xf32>
    %cst_43 = arith.constant dense<0.000000e+00> : vector<4x256xf32>
    %79 = tpu.matmul %71, %78, %cst_43 {dimension_numbers = #tpu.dot_dimension_numbers<[1], [0], [0], [1], [0, 0, 1, 1], [], []>} : vector<4x4xf32>, vector<4x256xf32>, vector<4x256xf32> -> vector<4x256xf32>
    %80 = arith.addf %69, %79 : vector<4x256xf32>
    %c0_44 = arith.constant 0 : index
    %c0_45 = arith.constant 0 : index
    %81 = vector.load %arg7[%c0_44, %c0_45] : memref<4x1xf32, #tpu.memory_space<vmem>>, vector<4x1xf32>
    %82 = vector.broadcast %81 : vector<4x1xf32> to vector<4x256xf32>
    %83 = arith.addf %80, %82 : vector<4x256xf32>
    %cst_46 = arith.constant 0.000000e+00 : f32
    %84 = vector.broadcast %cst_46 : f32 to vector<4x256xf32>
    %85 = arith.maximumf %83, %84 : vector<4x256xf32>
    %c0_47 = arith.constant 0 : index
    %c0_48 = arith.constant 0 : index
    %86 = vector.load %arg8[%c0_47, %c0_48] : memref<16x4xf32, #tpu.memory_space<vmem>>, vector<16x4xf32>
    %cst_49 = arith.constant dense<0.000000e+00> : vector<16x256xf32>
    %87 = tpu.matmul %86, %85, %cst_49 {dimension_numbers = #tpu.dot_dimension_numbers<[1], [0], [0], [1], [0, 0, 1, 1], [], []>} : vector<16x4xf32>, vector<4x256xf32>, vector<16x256xf32> -> vector<16x256xf32>
    %c0_50 = arith.constant 0 : index
    %c0_51 = arith.constant 0 : index
    %88 = vector.load %arg9[%c0_50, %c0_51] : memref<16x1xf32, #tpu.memory_space<vmem>>, vector<16x1xf32>
    %89 = vector.broadcast %88 : vector<16x1xf32> to vector<16x256xf32>
    %90 = arith.addf %87, %89 : vector<16x256xf32>
    %c0_52 = arith.constant 0 : index
    %c0_53 = arith.constant 0 : index
    %c0_54 = arith.constant 0 : index
    %91 = vector.load %arg10[%c0_52, %c0_53, %c0_54] : memref<1x16x256xf32, #tpu.memory_space<vmem>>, vector<1x16x256xf32>
    %92 = vector.shape_cast %91 : vector<1x16x256xf32> to vector<16x256xf32>
    %93 = vector.shape_cast %90 : vector<16x256xf32> to vector<1x16x256xf32>
    tpu.vector_store %arg10[%c0_52, %c0_53, %c0_54], %93 {strides = array<i32>} : memref<1x16x256xf32, #tpu.memory_space<vmem>>, vector<1x16x256xf32>,
    return
  }
  func.func @transform_0(%arg0: i32) -> (i32, i32, i32) {
    %c0_i32 = arith.constant 0 : i32
    %c0_i32_0 = arith.constant 0 : i32
    %c0_i32_1 = arith.constant 0 : i32
    return %arg0, %c0_i32, %c0_i32_0 : i32, i32, i32
  }
  func.func @transform_1(%arg0: i32) -> (i32, i32) {
    %c0_i32 = arith.constant 0 : i32
    %c0_i32_0 = arith.constant 0 : i32
    %c0_i32_1 = arith.constant 0 : i32
    return %c0_i32, %c0_i32_0 : i32, i32
  }
  func.func @transform_2(%arg0: i32) -> (i32, i32) {
    %c0_i32 = arith.constant 0 : i32
    %c0_i32_0 = arith.constant 0 : i32
    %c0_i32_1 = arith.constant 0 : i32
    return %c0_i32, %c0_i32_0 : i32, i32
  }
  func.func @transform_3(%arg0: i32) -> (i32, i32, i32) {
    %c0_i32 = arith.constant 0 : i32
    %c0_i32_0 = arith.constant 0 : i32
    %c0_i32_1 = arith.constant 0 : i32
    %c0_i32_2 = arith.constant 0 : i32
    return %c0_i32, %c0_i32_0, %c0_i32_1 : i32, i32, i32
  }
  func.func @transform_4(%arg0: i32) -> (i32, i32) {
    %c0_i32 = arith.constant 0 : i32
    %c0_i32_0 = arith.constant 0 : i32
    %c0_i32_1 = arith.constant 0 : i32
    return %c0_i32, %c0_i32_0 : i32, i32
  }
  func.func @transform_5(%arg0: i32) -> (i32, i32, i32) {
    %c0_i32 = arith.constant 0 : i32
    %c0_i32_0 = arith.constant 0 : i32
    %c0_i32_1 = arith.constant 0 : i32
    %c0_i32_2 = arith.constant 0 : i32
    return %c0_i32, %c0_i32_0, %c0_i32_1 : i32, i32, i32
  }
  func.func @transform_6(%arg0: i32) -> (i32, i32) {
    %c0_i32 = arith.constant 0 : i32
    %c0_i32_0 = arith.constant 0 : i32
    %c0_i32_1 = arith.constant 0 : i32
    return %c0_i32, %c0_i32_0 : i32, i32
  }
  func.func @transform_7(%arg0: i32) -> (i32, i32) {
    %c0_i32 = arith.constant 0 : i32
    %c0_i32_0 = arith.constant 0 : i32
    %c0_i32_1 = arith.constant 0 : i32
    return %c0_i32, %c0_i32_0 : i32, i32
  }
  func.func @transform_8(%arg0: i32) -> (i32, i32) {
    %c0_i32 = arith.constant 0 : i32
    %c0_i32_0 = arith.constant 0 : i32
    %c0_i32_1 = arith.constant 0 : i32
    return %c0_i32, %c0_i32_0 : i32, i32
  }
  func.func @transform_9(%arg0: i32) -> (i32, i32, i32) {
    %c0_i32 = arith.constant 0 : i32
    %c0_i32_0 = arith.constant 0 : i32
    %c0_i32_1 = arith.constant 0 : i32
    return %arg0, %c0_i32, %c0_i32_0 : i32, i32, i32
  }
}

</mosaic_0001>

<bundles_post_ra>
// kernel: tpu_custom_call.1
= control target key start
LH: loop header
LB: loop body
LE: loop exit
PB: predicated region body
PF: predicated region fallthrough
CT: control target
= control target key end

     0   :  { %14 = vsyncpa [#allocation3], 0  ;;  %s1360_s0 = inlined_call_operand.vmem [shape: f32[2,4,256], index: 0, kind: input, shape index: {}]   ;;  %s1361_s1 = inlined_call_operand.vmem [shape: f32[4,4], index: 1, kind: input, shape index: {}]   ;;  %s1362_s2 = inlined_call_operand.vmem [shape: f32[4,1], index: 2, kind: input, shape index: {}]   ;;  %s1363_s3 = inlined_call_operand.vmem [shape: f32[3,4,4], index: 3, kind: input, shape index: {}]   ;;  %s1364_s4 = inlined_call_operand.vmem [shape: f32[4,1], index: 4, kind: input, shape index: {}]   ;;  %s1365_s5 = inlined_call_operand.vmem [shape: f32[3,4,4], index: 5, kind: input, shape index: {}]   ;;  %s1366_s6 = inlined_call_operand.vmem [shape: f32[4,1], index: 6, kind: input, shape index: {}]   ;;  %s1367_s7 = inlined_call_operand.vmem [shape: f32[16,4], index: 7, kind: input, shape index: {}]   ;;  %s1368_s8 = inlined_call_operand.vmem [shape: f32[16,1], index: 8, kind: input, shape index: {}]   ;;  %s1369_s9 = inlined_call_operand.hbm [shape: f32[2,16,256], index: 9, kind: output, shape index: {}]  }
   0x1   :  { %16 = vsyncpa [#allocation3 + $0x1], 0  ;;  %s1183_s30 = smov 0   ;;  %s1185_s10 = smov 0  }
   0x2   :  { %s1187_s11 = smov 0   ;;  %s1189_s12 = smov 0  }
   0x3 LB: > { %s1204_s13 = sadd.s32 4294967295, %s1125_s12   ;;  %s963_s14 = sadd.s32 4294967294, %s1125_s12   ;;  %s1125_s12 = sphi %s1189_s12, %s1375_s12   ;;  %s1121_s11 = sphi %s1187_s11, %s1374_s11   ;;  %s1117_s10 = sphi %s1185_s10, %s1373_s10   ;;  %s1113_s30 = sphi %s1183_s30, %s1372_s30  }
   0x4   : > { %s1208_s15 = sadd.s32 1, %s1125_s12   ;;  %s223_s16 = sadd.s32 1, %s1121_s11 }
   0x5   : > { %s220_s17 = ssub.s32 %s1125_s12, %s1208_s15  ;;  %p233_p0 = scmp.ne.s32.totalorder %s1121_s11, %s1117_s10 }
   0x6   : > { %p221_p1 = scmp.eq.s32.totalorder %s220_s17, 0  ;;  %p234_p2 = scmp.eq.s32.totalorder %s1204_s13, 1 }
   0x7   : > { %p239_p3 = scmp.ne.s32.totalorder %s1117_s10, %s1113_s30  ;;  %p240_p4 = scmp.eq.s32.totalorder %s963_s14, 1 }
   0x8   : > { %s1219_s18 = scalar_select %p221_p1, %s1121_s11, %s223_s16  }
   0x9   : > { %p1221_p5 = por %p234_p2, %p233_p0  ;;  %p1225_p6 = por %p240_p4, %p239_p3 }
   0xa   : > { %p966_p7 = scmp.ge.s32.totalorder %s1125_s12, 1  ;;  %p290_p8 = scmp.lt.s32.totalorder %s1125_s12, 3 }
   0xc   : > { %p291_p9 = pnand %p966_p7, %p290_p8 }
   0xd   : > { %p326_p10 = scmp.lt.s32.totalorder (!%p291_p9), %s1204_s13, 1  ;;  %s1128_s14 = smov (!%p291_p9), 16  }
   0xe   : > { %294 = sbr.rel (%p291_p9) target bundleno = 829 (0x33d), region = 56  ;;  %s1129_s16 = smov (!%p291_p9), 112  }
   0xf   : > { %s1130_s28 = smov (!%p291_p9), 1   ;;  %s1131_s29 = smov (!%p291_p9), 127  }
  0x10   : > { %s1014_s26 = sshll.u32 (!%p291_p9), %s1204_s13, 5 }
  0x13   : > { %v1127_v0 = vmov 0   ;;  %v360_v1 = vld [vmem:[%s1362_s2] sm:$0xf]  ;;  %s327_s23 = scalar_select %p326_p10, %s1204_s13, 1  ;;  %vm374_vm0 = vcmask 1043456   ;;  %vm370_vm1 = vcmask 31744   ;;  %v332_v15 = vlaneseq }
  0x14   : > { %1060 = vset.pattern.permute.xlu0 %v1127_v0  ;;  %1061 = vset.pattern.permute.xlu2 %v1127_v0  ;;  %v359_v3 = vld [vmem:[%s1361_s1] sm:$0xf]  ;;  %v974_v13 = vld [vmem:[%s1363_s3 + $0x4] sm:$0xf]  ;;  %v983_v20 = vld [vmem:[%s1363_s3 + $0x8] sm:$0xf] }
  0x15   : > { %363 = vperm.xlu0 %1060, %v360_v1   ;;  %1062 = vset.pattern.permute.xlu1 %v1127_v0  ;;  %s1013_s24 = sshll.u32 %s327_s23, 3  ;;  %v605_v14 = vld [vmem:[%s1364_s4] sm:$0xf]  ;;  %v1258_v16 = vand.u32 127, %v332_v15  ;;  %v812_v46 = vld [vmem:[%s1368_s8 + $0x8] sm:$0xff] }
  0x16   : > { %s330_s27 = scalar_lea.vmem %s1360_s0, %s1013_s24  ;;  %v421_v26 = vld [vmem:[%s1363_s3] sm:$0xf]  ;;  %v988_v47 = vld [vmem:[%s1365_s5 + $0x4] sm:$0xf]  ;;  %v997_v62 = vld [vmem:[%s1365_s5 + $0x8] sm:$0xf] }
  0x17   : > { %v331_v2 = vld [vmem:[%s330_s27] sm:$0xff]  ;;  %v1261_v17 = vadd.s32 128, %v1258_v16  ;;  %vm545_vm2 = vcmp.lt.s32.totalorder %v1258_v16, 112  ;;  %vm428_vm4 = vcmp.lt.s32.totalorder %v1258_v16, 16  ;;  %vm422_vm5 = vcmp.ge.s32.totalorder %v1258_v16, 16  ;;  %s323_s24 = sand.u32 1, %s1117_s10  }
  0x18   : > { %367 = vst [vmem:[#allocation1] ss:$2 sm:$0xff] %v331_v2  ;;  %v811_v45 = vld [vmem:[%s1368_s8] sm:$0xff]  ;;  %v339_v49 = vand.u32 15, %v1258_v16  ;;  %vm622_vm6 = vcmp.lt.s32.totalorder %v1258_v16, 1  ;;  %vm739_vm9 = vcmp.lt.s32.totalorder %v1258_v16, 127 }
  0x19   : > { %vm540_vm3 = vcmp.lt.s32.totalorder %v1261_v17, 240  ;;  %v799_v48 = vld [vmem:[%s1366_s6] sm:$0xf]  ;;  %v346_v50 = vand.u32 15, %v1261_v17  ;;  %v810_v17 = vld [vmem:[%s1367_s7 + $0x8] sm:$0xff]  ;;  %s967_s25 = sshll.u32 %s323_s24, 5 }
  0x1a   : > { %vm616_vm7 = vcmp.ge.s32.totalorder %v339_v49, 1  ;;  %v615_v55 = vld [vmem:[%s1365_s5] sm:$0xf]  ;;  %vm733_vm10 = vcmp.le.s32.totalorder %v339_v49, 14  ;;  %s325_s27 = scalar_lea.vmem [#allocation2], %s967_s25  ;;  %s886_s13 = scalar_lea.sflag [#allocation3], %s323_s24 }
  0x1b   : > { %vm617_vm8 = vcmp.ge.s32.totalorder %v346_v50, 1  ;;  %vm734_vm11 = vcmp.le.s32.totalorder %v346_v50, 14  ;;  %v809_v16 = vld [vmem:[%s1367_s7] sm:$0xff]  ;;  %s898_s17 = sshll.u32 %s325_s27, 4  ;;  %s899_s17 = int_to_ptr.vmem [resolvable:$true] %s898_s17 }
  0x1f   : > { %v368_v4 = vld.sshfl [vmem:[#allocation1] sm:$0xff pattern:$0x75316420]  ;;  %v369_v5 = vld.sshfl [vmem:[#allocation1 + $0x8] sm:$0xff pattern:$0x75316420] }
  0x20   : > { %970 = vmatpush.msk.msra.mxu0 %vm374_vm0, %v368_v4  ;;  %972 = vmatpush.msk.msra.mxu1 %vm374_vm0, %v369_v5 }
  0x21   : > { %971 = vmatmul.msk.f32.vlgmr.msra.gmra.mxu0 %vm370_vm1, %v359_v3  ;;  %973 = vmatmul.msk.f32.vlgmr.msra.gmra.mxu1 %vm370_vm1, %v359_v3 }
  0x87   : > { %v364_v6 = vpop.permute.xlu0 %363 }
  0x9e   : > { %v396_v7 = vpop.f32.mrf.mxu0  ;;  %v416_v8 = vpop.f32.mrf.mxu1 }
  0x9f   : > { %v397_v9 = vadd.f32 %v396_v7, %v364_v6  ;;  %v417_v10 = vadd.f32 %v416_v8, %v364_v6 }
  0xa1   : > { %v419_v11 = vmax.f32 %v397_v9, 0.0  ;;  %v420_v12 = vmax.f32 %v417_v10, 0.0 }
  0xa3   : > { %426 = vrot.lane.b32.xlu2 %v420_v12, %s1128_s14  ;;  %543 = vrot.lane.b32.xlu1 %v420_v12, %s1129_s16 }
  0xa4   : > { %977 = vmatpush.msk.msra.mxu3 %vm374_vm0, %v420_v12  ;;  %541 = vrot.lane.b32.xlu0 %v419_v11, %s1129_s16  ;;  %s897_s16 = scalar_lea.hbm %s1369_s9, %s1014_s26 }
  0xa5   : > { %975 = vmatpush.msk.msra.mxu2 %vm374_vm0, %v419_v11  ;;  %978 = vmatmul.msk.f32.vlgmr.msra.gmra.mxu3 %vm370_vm1, %v974_v13  ;;  %s900_s21 = sshll.u32 %s897_s16, 4  ;;  %s901_s21 = int_to_ptr.hbm [resolvable:$true] %s900_s21 }
  0xa6   : > { %976 = vmatmul.msk.f32.vlgmr.msra.gmra.mxu2 %vm370_vm1, %v974_v13  ;;  %s1077_s22 = sshra.s32 %s901_s21, 4  ;;  %s1078_s22 = int_to_ptr.hbm [resolvable:$true] %s1077_s22 }
  0xa7   : > { %s1079_s23 = scalar_lea.hbm %s1078_s22, 32  ;;  %p1084_p0 = scmp.lt.s32.totalorder %s1078_s22, %s1369_s9 }
  0xa8   : > { %p1080_p11 = scmp.ne.s32.totalorder %s1078_s22, %s1079_s23 }
  0xaa   : > { %p1081_p12 = pnand %p1080_p11, %p1221_p5 }
  0xab   : > { %424 = vrot.lane.b32.xlu1 %v419_v11, %s1128_s14  ;;  %608 = vperm.xlu2 %1061, %v605_v14  }
  0xac   : > { %p1082_p13 = pneg %p1081_p12 }
  0xfd   : > { %v427_v24 = vpop.permute.xlu2 %426 }
 0x105   : > { %v609_v38 = vpop.permute.xlu2 %608 }
 0x115   : > { %v544_v18 = vpop.permute.xlu1 %543 }
 0x116   : > { %v542_v19 = vpop.permute.xlu0 %541 }
 0x117   : > { %v547_v21 = vsel %vm545_vm2, %v544_v18, %v542_v19  ;;  %v546_v22 = vsel %vm545_vm2, %v542_v19, %v544_v18 }
 0x118   : > { %984 = vmatpush.msk.msrb.mxu2 %vm374_vm0, %v546_v22  ;;  %v553_v23 = vsel %vm540_vm3, %v547_v21, 0.0 }
 0x119   : > { %986 = vmatpush.msk.msrb.mxu3 %vm374_vm0, %v553_v23  ;;  %985 = vmatmul.msk.f32.vlgmr.msrb.gmra.mxu2 %vm370_vm1, %v983_v20 }
 0x11a   : > { %987 = vmatmul.msk.f32.vlgmr.msrb.gmra.mxu3 %vm370_vm1, %v983_v20 }
 0x11d   : > { %v425_v25 = vpop.permute.xlu1 %424 }
 0x11e   : > { %v430_v27 = vsel %vm428_vm4, %v427_v24, %v425_v25  ;;  %v429_v28 = vsel %vm428_vm4, %v425_v25, %v427_v24 }
 0x11f   : > { %981 = vmatpush.msk.msrb.mxu1 %vm374_vm0, %v429_v28  ;;  %v435_v29 = vsel %vm422_vm5, %v430_v27, 0.0 }
 0x120   : > { %979 = vmatpush.msk.msrb.mxu0 %vm374_vm0, %v435_v29  ;;  %982 = vmatmul.msk.f32.vlgmr.msrb.gmra.mxu1 %vm370_vm1, %v421_v26 }
 0x121   : > { %980 = vmatmul.msk.f32.vlgmr.msrb.gmra.mxu0 %vm370_vm1, %v421_v26 }
 0x128   : > { %v485_v30 = vpop.f32.mrf.mxu3 }
 0x129   : > { %v465_v31 = vpop.f32.mrf.mxu2 }
 0x19c   : > { %v580_v36 = vpop.f32.mrf.mxu2 }
 0x19d   : > { %v534_v32 = vpop.f32.mrf.mxu1  ;;  %v600_v33 = vpop.f32.mrf.mxu3 }
 0x19e   : > { %v535_v34 = vadd.f32 %v534_v32, %v485_v30  ;;  %v514_v35 = vpop.f32.mrf.mxu0 }
 0x19f   : > { %v515_v37 = vadd.f32 %v514_v35, %v465_v31 }
 0x1a0   : > { %v604_v39 = vadd.f32 %v600_v33, %v535_v34 }
 0x1a1   : > { %v603_v40 = vadd.f32 %v580_v36, %v515_v37 }
 0x1a2   : > { %v612_v41 = vadd.f32 %v609_v38, %v604_v39 }
 0x1a3   : > { %v611_v42 = vadd.f32 %v609_v38, %v603_v40 }
 0x1a4   : > { %v614_v43 = vmax.f32 %v612_v41, 0.0 }
 0x1a5   : > { %v613_v44 = vmax.f32 %v611_v42, 0.0 }
 0x1a6   : > { %620 = vrot.lane.b32.xlu1 %v614_v43, %s1130_s28  ;;  %991 = vmatpush.msk.msra.mxu1 %vm374_vm0, %v614_v43 }
 0x1a7   : > { %735 = vrot.lane.b32.xlu2 %v613_v44, %s1131_s29  ;;  %618 = vrot.lane.b32.xlu0 %v613_v44, %s1130_s28  ;;  %s1083_s28 = scalar_lea.hbm %s1369_s9, 64 }
 0x1a8   : > { %989 = vmatpush.msk.msra.mxu0 %vm374_vm0, %v613_v44  ;;  %992 = vmatmul.msk.f32.vlgmr.msra.gmra.mxu1 %vm370_vm1, %v988_v47  ;;  %p1085_p1 = scmp.lt.s32.totalorder %s1083_s28, %s1079_s23 }
 0x1a9   : > { %990 = vmatmul.msk.f32.vlgmr.msra.gmra.mxu0 %vm370_vm1, %v988_v47 }
 0x1aa   : > { %p1086_p2 = por %p1085_p1, %p1084_p0 }
 0x1ac   : > { %p1087_p3 = pnand %p1086_p2, %p1082_p13 }
 0x1ae   : > { %802 = vperm.xlu1 %1062, %v799_v48  }
 0x1af   : > { %815 = vperm.xlu2 %1061, %v811_v45   ;;  %737 = vrot.lane.b32.xlu0 %v614_v43, %s1131_s29 }
 0x1b7   : > { %820 = vperm.xlu0 %1060, %v812_v46  }
 0x201   : > { %v736_v58 = vpop.permute.xlu2 %735 }
 0x209   : > { %v816_v18 = vpop.permute.xlu2 %815 }
 0x218   : > { %v621_v51 = vpop.permute.xlu1 %620 }
 0x219   : > { %v619_v52 = vpop.permute.xlu0 %618 }
 0x21a   : > { %v623_v53 = vsel %vm622_vm6, %v619_v52, %v621_v51  ;;  %v624_v54 = vsel %vm622_vm6, %v621_v51, %v619_v52 }
 0x21b   : > { %v629_v56 = vsel %vm616_vm7, %v624_v54, 0.0  ;;  %v630_v57 = vsel %vm617_vm8, %v623_v53, 0.0 }
 0x21c   : > { %993 = vmatpush.msk.msra.mxu2 %vm374_vm0, %v629_v56  ;;  %995 = vmatpush.msk.msra.mxu3 %vm374_vm0, %v630_v57 }
 0x21d   : > { %994 = vmatmul.msk.f32.vlgmr.msra.gmra.mxu2 %vm370_vm1, %v615_v55  ;;  %996 = vmatmul.msk.f32.vlgmr.msra.gmra.mxu3 %vm370_vm1, %v615_v55 }
 0x220   : > { %v803_v7 = vpop.permute.xlu1 %802 }
 0x221   : > { %v738_v59 = vpop.permute.xlu0 %737 }
 0x222   : > { %v740_v60 = vsel %vm739_vm9, %v736_v58, %v738_v59  ;;  %v741_v61 = vsel %vm739_vm9, %v738_v59, %v736_v58 }
 0x223   : > { %v746_v63 = vsel %vm733_vm10, %v740_v60, 0.0  ;;  %v747_v0 = vsel %vm734_vm11, %v741_v61, 0.0 }
 0x224   : > { %998 = vmatpush.msk.msrb.mxu0 %vm374_vm0, %v746_v63  ;;  %1000 = vmatpush.msk.msrb.mxu1 %vm374_vm0, %v747_v0 }
 0x225   : > { %999 = vmatmul.msk.f32.vlgmr.msrb.gmra.mxu0 %vm370_vm1, %v997_v62  ;;  %1001 = vmatmul.msk.f32.vlgmr.msrb.gmra.mxu1 %vm370_vm1, %v997_v62  ;;  %v679_v2 = vpop.f32.mrf.mxu1 }
 0x226   : > { %v659_v1 = vpop.f32.mrf.mxu0 }
 0x229   : > { %v821_v23 = vpop.permute.xlu0 %820 }
 0x2a0   : > { %v708_v3 = vpop.f32.mrf.mxu2  ;;  %v728_v4 = vpop.f32.mrf.mxu3 }
 0x2a1   : > { %v709_v5 = vadd.f32 %v708_v3, %v659_v1  ;;  %v729_v6 = vadd.f32 %v728_v4, %v679_v2 }
 0x2a2   : > { %v774_v8 = vpop.f32.mrf.mxu0  ;;  %v794_v9 = vpop.f32.mrf.mxu1 }
 0x2a3   : > { %v797_v10 = vadd.f32 %v774_v8, %v709_v5  ;;  %v798_v11 = vadd.f32 %v794_v9, %v729_v6 }
 0x2a5   : > { %v805_v12 = vadd.f32 %v803_v7, %v797_v10  ;;  %v806_v13 = vadd.f32 %v803_v7, %v798_v11 }
 0x2a7   : > { %v807_v14 = vmax.f32 %v805_v12, 0.0  ;;  %v808_v15 = vmax.f32 %v806_v13, 0.0 }
 0x2a9   : > { %1002 = vmatpush.msk.msrb.mxu2 %vm374_vm0, %v807_v14  ;;  %1005 = vmatpush.msk.msrb.mxu3 %vm374_vm0, %v808_v15 }
 0x2aa   : > { %1003 = vmatmul.msk.f32.vlgmr.msrb.gmra.mxu2 %vm370_vm1, %v809_v16  ;;  %1006 = vmatmul.msk.f32.vlgmr.msrb.gmra.mxu3 %vm370_vm1, %v809_v16 }
 0x2b2   : > { %1004 = vmatmul.msk.f32.gmra.mxu2 %vm370_vm1, %v810_v17  ;;  %1007 = vmatmul.msk.f32.gmra.mxu3 %vm370_vm1, %v810_v17 }
 0x32d   : > { %v852_v19 = vpop.f32.mrf.mxu2  ;;  %v875_v20 = vpop.f32.mrf.mxu3 }
 0x32e   : > { %v853_v21 = vadd.f32 %v852_v19, %v816_v18  ;;  %v876_v22 = vadd.f32 %v875_v20, %v816_v18 }
 0x330   : > { %881 = vst [vmem:[%s325_s27] sm:$0xff] %v853_v21 }
 0x331   : > { %882 = vst [vmem:[%s325_s27 + $0x8] sm:$0xff] %v876_v22 }
 0x335   : > { %v855_v24 = vpop.f32.mrf.mxu2  ;;  %v878_v25 = vpop.f32.mrf.mxu3 }
 0x336   : > { %v856_v26 = vadd.f32 %v855_v24, %v821_v23  ;;  %v879_v27 = vadd.f32 %v878_v25, %v821_v23 }
 0x338   : > { %883 = vst [vmem:[%s325_s27 + $0x10] sm:$0xff] %v856_v26 }
 0x339   : > { %884 = vst [vmem:[%s325_s27 + $0x18] sm:$0xff] %v879_v27 }
 0x33a   : > { %1090 = shalt.err (!%p1087_p3)
}
 0x33b   : > { %s1132_s24 = smov 256  }
 0x33c   : > { %1015 = dma.vmem_to_hbm [thread:$0]  (%p1221_p5), %s899_s17, 512, %s901_s21, %s886_s13, %s1132_s24, %s1132_s24, %s1128_s14  }
 0x33d PF: > { %p1021_p4 = scmp.ge.s32.totalorder %s1125_s12, 2  ;;  %s915_s27 = sand.u32 1, %s1113_s30  }
 0x33e   : > { %s916_s25 = scalar_lea.sflag [#allocation3], %s915_s27 }
 0x33f   : > { %p1018_p7 = pnand %p1021_p4, %p1225_p6 }
 0x341   : > { %p1019_p8 = pneg %p1018_p7 }
 0x343   : > { %1108 = dma.done.wait (%p1019_p8), %s916_s25, 512  }
 0x344   : > { %1110 = vsyncadd (%p1019_p8), %s916_s25, 4294966784  ;;  %p19_p9 = scmp.ge.s32.totalorder %s1208_s15, 4   ;;  %s1372_s30 = smov %s1117_s10 }
 0x345   : > { %s1373_s10 = smov %s1121_s11  ;;  %s1374_s11 = smov %s1219_s18 }
 0x346   : > { %s1375_s12 = smov %s1208_s15  ;;  %21 = sbr.rel (!%p19_p9) target bundleno = 3 (0x3), region = 95 }
 0x34b   :  { %922 = vsyncpa [#allocation3], 1 }
 0x34c   :  { %924 = vsyncpa [#allocation3 + $0x1], 1 }

</bundles_post_ra>
